<compile_context>
chip_gen: v5e
topology: v5e:2x2
jax: 0.10.0
libtpu: 0.0.40
codegen_flags: <defaults>
</compile_context>

<pallas_src>
import collections
from functools import partial

import jax
import jax.numpy as jnp
import numpy as np
from jax import lax
from jax.experimental import pallas as pl
from jax.experimental.pallas import tpu as pltpu


# --------------------------------------------------------------------------
# Layout helpers: logical flat feature vector (F,) <-> dense (8, F_pad//8)
# --------------------------------------------------------------------------
def _pack_state(x_flat, f_pad):
    """(..., F) f32 -> (..., 8, F_pad//8) sublane/lane-dense layout."""
    f = x_flat.shape[-1]
    pad = [(0, 0)] * (x_flat.ndim - 1) + [(0, f_pad - f)]
    x = jnp.pad(x_flat, pad)
    return x.reshape(x_flat.shape[:-1] + (8, f_pad // 8))


def _unpack_state(x_packed, f):
    lead = x_packed.shape[:-2]
    return x_packed.reshape(lead + (-1,))[..., :f]


def _choose_rb(r, requested=None):
    """Pick a feature-block width (lanes): multiple of 128 that divides R."""
    target = requested if requested is not None else (r if r <= 512 else 512)
    target = max(128, min(target, r))
    best = 128
    rb = 128
    while rb <= target:
        if r % rb == 0:
            best = rb
        rb += 128
    return best


# --------------------------------------------------------------------------
# Kernel: one grid step processes BT filter steps on one (8, RB) feature tile
# --------------------------------------------------------------------------
def _mwf_kernel(window_size, bt, meta_ref, new_ref, sum_ref, corr_ref, ring_ref,
                sum_out, corr_out, avg_out, ring_out):
    b = pl.program_id(1)  # time-block index ("arbitrary" axis)

    @pl.when(b == 0)
    def _init():
        sum_out[...] = sum_ref[...]
        corr_out[...] = corr_ref[...]
        ring_out[...] = ring_ref[...]

    slot0 = meta_ref[0]       # ring slot of the first step (already mod W on host)
    t_total = meta_ref[1]     # actual number of valid steps (for tail masking)
    base = b * bt
    # One integer mod per time-block; per-step wrap is a conditional subtract.
    slot_start = (slot0 + base) % window_size

    pow2 = (window_size & (window_size - 1)) == 0
    inv_w = np.float32(1.0 / window_size)

    def step(i, carry):
        slot, s, c = carry
        valid = (base + i) < t_total

        nv = new_ref[i]                 # (8, RB) — one dense tile per step
        old = ring_out[slot]            # zeros during warm-up -> exact no-op
        neg_old = -old

        # --- Neumaier step 1: subtract the value leaving the window ---------
        ns1 = s + neg_old
        t1 = jnp.where(jnp.abs(s) >= jnp.abs(neg_old),
                       (s - ns1) + neg_old,
                       (neg_old - ns1) + s)
        c1 = c + t1

        # --- Neumaier step 2: add the new value ------------------------------
        ns2 = ns1 + nv
        t2 = jnp.where(jnp.abs(ns1) >= jnp.abs(nv),
                       (ns1 - ns2) + nv,
                       (nv - ns2) + ns1)
        c2 = c1 + t2

        if pow2:
            avg_out[i] = (ns2 + c2) * inv_w          # exact for powers of two
        else:
            avg_out[i] = (ns2 + c2) / window_size    # bit-exact vs torch reference
        ring_out[slot] = jnp.where(valid, nv, old)   # no-op on padded tail steps

        nxt = slot + 1
        nxt = jnp.where(nxt == window_size, 0, nxt)
        return (jnp.where(valid, nxt, slot),
                jnp.where(valid, ns2, s),
                jnp.where(valid, c2, c))

    _, s_f, c_f = lax.fori_loop(0, bt, step,
                                (slot_start, sum_out[...], corr_out[...]),
                                unroll=True)
    sum_out[...] = s_f
    corr_out[...] = c_f


def _make_mwf_fn(window_size, r, rb, bt, nb):
    """Builds a jitted function processing nb*bt steps in one pallas_call."""
    nf = r // rb
    w = window_size
    kernel = partial(_mwf_kernel, window_size, bt)

    smem_spec = pl.BlockSpec(memory_space=pltpu.MemorySpace.SMEM)
    state_spec = pl.BlockSpec((8, rb), lambda f, b: (0, f))            # resident over T
    ring_spec = pl.BlockSpec((w, 8, rb), lambda f, b: (0, 0, f))       # resident over T
    seq_spec = pl.BlockSpec((bt, 8, rb), lambda f, b: (b, 0, f))       # streamed

    # Rough VMEM estimate; only raise the scoped limit when actually needed.
    vmem_est = 4 * (2 * bt * 8 * rb * 2      # new + avg, double buffered
                    + w * 8 * rb * 2 * 2     # ring in + out
                    + 8 * rb * 4 * 2)        # sum/corr in + out
    cp_kwargs = {}
    if vmem_est > 28 * (1 << 20):
        cp_kwargs["vmem_limit_bytes"] = min(int(vmem_est * 1.25), 120 * (1 << 20))

    pcall = pl.pallas_call(
        kernel,
        grid=(nf, nb),
        out_shape=(
            jax.ShapeDtypeStruct((8, r), jnp.float32),            # sum
            jax.ShapeDtypeStruct((8, r), jnp.float32),            # correction
            jax.ShapeDtypeStruct((nb * bt, 8, r), jnp.float32),   # averages
            jax.ShapeDtypeStruct((w, 8, r), jnp.float32),         # ring buffer
        ),
        in_specs=[smem_spec, seq_spec, state_spec, state_spec, ring_spec],
        out_specs=(state_spec, state_spec, seq_spec, ring_spec),
        # in-place persistent state (P8): sum->sum, corr->corr, ring->ring
        input_output_aliases={2: 0, 3: 1, 4: 3},
        compiler_params=pltpu.CompilerParams(
            dimension_semantics=("parallel", "arbitrary"), **cp_kwargs),
    )

    def step_fn(meta, new_vals, s, c, ring):
        return pcall(meta, new_vals, s, c, ring)

    return jax.jit(step_fn, donate_argnums=(2, 3, 4))


# --------------------------------------------------------------------------
# Python wrapper (stateful, mirrors TorchMovingWindowFilter)
# --------------------------------------------------------------------------
class MovingWindowFilter:
    """JAX/Pallas port of TorchMovingWindowFilter; all state lives on device."""

    def __init__(self, window_size: int, state_dim: int = 1, num_envs: int = 1,
                 feature_block_lanes=None):
        assert window_size > 0
        self._window_size = window_size
        self.state_dim = state_dim
        self.num_envs = num_envs
        self._feature_block_lanes = feature_block_lanes
        self._BT_MAX = 64          # time steps per grid iteration (unrolled)
        self._fn_cache = {}
        self._reset_state()

    # -- state -------------------------------------------------------------
    def _set_dims(self):
        self._F = self.num_envs * self.state_dim
        self._F_pad = -(-self._F // 1024) * 1024     # multiple of 8*128
        self._R = self._F_pad // 8                   # lanes (multiple of 128)
        self._RB = _choose_rb(self._R, self._feature_block_lanes)

    def _reset_state(self):
        self._set_dims()
        self._sum = jnp.zeros((8, self._R), jnp.float32)
        self._corr = jnp.zeros((8, self._R), jnp.float32)
        self._ring = jnp.zeros((self._window_size, 8, self._R), jnp.float32)
        self._slot = 0            # kept modulo window_size on the host

    def _get_fn(self, bt, nb):
        key = (self._R, self._RB, bt, nb)
        if key not in self._fn_cache:
            self._fn_cache[key] = _make_mwf_fn(self._window_size, self._R,
                                               self._RB, bt, nb)
        return self._fn_cache[key]

    def _maybe_resize(self, n):
        # Matches the torch module's repeat(N,1,1) broadcast-resize path.
        if n != self.num_envs and self.num_envs == 1:
            f_old = self.state_dim

            def retile(packed):
                flat = _unpack_state(packed, f_old)
                reps = (1,) * (flat.ndim - 1) + (n,)
                return jnp.tile(flat, reps)

            s_flat, c_flat, r_flat = (retile(self._sum), retile(self._corr),
                                      retile(self._ring))
            self.num_envs = n
            self._set_dims()
            self._sum = _pack_state(s_flat, self._F_pad)
            self._corr = _pack_state(c_flat, self._F_pad)
            self._ring = _pack_state(r_flat, self._F_pad)

    # -- forward -----------------------------------------------------------
    def forward_many(self, new_values):
        """new_values: [T, N, 1, state_dim]; T sequential steps, one dispatch."""
        new_values = jnp.asarray(new_values, jnp.float32)
        t, n = new_values.shape[0], new_values.shape[1]
        self._maybe_resize(n)

        nv = _pack_state(new_values.reshape(t, self._F), self._F_pad)  # (T,8,R)
        bt = max(1, min(self._BT_MAX, t))
        nb = -(-t // bt)
        t_pad = nb * bt
        if t_pad != t:
            nv = jnp.pad(nv, ((0, t_pad - t), (0, 0), (0, 0)))

        meta = jnp.array([self._slot, t], jnp.int32)
        fn = self._get_fn(bt, nb)
        self._sum, self._corr, avgs, self._ring = fn(
            meta, nv, self._sum, self._corr, self._ring)
        self._slot = (self._slot + t) % self._window_size

        avgs_flat = _unpack_state(avgs[:t], self._F)
        return avgs_flat.reshape(t, self.num_envs, 1, self.state_dim)

    def __call__(self, new_value):
        # new_value: [N, 1, state_dim]. For rollouts, prefer forward_many.
        return self.forward_many(jnp.asarray(new_value, jnp.float32)[None])[0]


# --------------------------------------------------------------------------
# Pure-numpy reference (exact emulation of the torch module)
# --------------------------------------------------------------------------
def _reference_step(deque, s, c, nv, window_size):
    def neumaier(s, c, v):
        ns = s + v
        t = np.where(np.abs(s) >= np.abs(v), (s - ns) + v, (v - ns) + s)
        return ns, c + t
    if len(deque) >= window_size:
        s, c = neumaier(s, c, -deque[0])
    s, c = neumaier(s, c, nv)
    deque.append(nv)
    return s, c, (s + c) / window_size


def _run_reference(new_values_np, window_size):
    """new_values_np: (T, N, D) -> (T, N, D) averages."""
    t, n, d = new_values_np.shape
    dq = collections.deque(maxlen=window_size)
    s = np.zeros((n, d), np.float32)
    c = np.zeros((n, d), np.float32)
    outs = []
    for i in range(t):
        s, c, avg = _reference_step(dq, s, c, new_values_np[i], window_size)
        outs.append(avg)
    return np.stack(outs, axis=0)


if __name__ == "__main__":
    key = jax.random.PRNGKey(0)

    # ---- Test 1: small config (warm-up, full-window subtract, ring wrap) ----
    window_size, state_dim, num_envs, n_steps = 4, 3, 2, 7
    k1, k2 = jax.random.split(key)
    vals = jax.random.normal(k1, (n_steps, num_envs, 1, state_dim), jnp.float32)
    vals_np = np.asarray(vals).reshape(n_steps, num_envs, state_dim)
    ref = _run_reference(vals_np, window_size)

    # path 1: step-by-step __call__ (T=1 per dispatch)
    filt = MovingWindowFilter(window_size, state_dim, num_envs)
    out = None
    for i in range(n_steps):
        out = filt(vals[i])
        np.testing.assert_allclose(
            np.asarray(out).reshape(num_envs, state_dim), ref[i],
            rtol=1e-6, atol=1e-6)

    # path 2: all T steps fused into a single pallas_call
    filt2 = MovingWindowFilter(window_size, state_dim, num_envs)
    outs = filt2.forward_many(vals)
    np.testing.assert_allclose(
        np.asarray(outs).reshape(n_steps, num_envs, state_dim), ref,
        rtol=1e-6, atol=1e-6)

    # ---- Test 2: exercise feature-block axis (NF>1), multi T-blocks + tail --
    w2, d2, n2, t2 = 5, 5, 256, 19
    vals2 = jax.random.normal(k2, (t2, n2, 1, d2), jnp.float32)
    ref2 = _run_reference(np.asarray(vals2).reshape(t2, n2, d2), w2)
    filt3 = MovingWindowFilter(w2, d2, n2, feature_block_lanes=128)
    filt3._BT_MAX = 8          # force NB=3 with a masked remainder block
    outs2 = filt3.forward_many(vals2)
    np.testing.assert_allclose(
        np.asarray(outs2).reshape(t2, n2, d2), ref2, rtol=1e-6, atol=1e-6)

    jax.block_until_ready((out, outs, outs2))
    assert out.shape == (num_envs, 1, state_dim)
    assert outs.shape == (n_steps, num_envs, 1, state_dim)
    assert outs2.shape == (t2, n2, 1, d2)
    print("KERNEL_OK")
</pallas_src>

<mosaic_0001>
module attributes {stable_mosaic.version = 11 : i64} {
  func.func @_mwf_kernel(%arg0: i32, %arg1: i32, %arg2: memref<2xi32, #tpu.memory_space<smem>>, %arg3: memref<1x8x128xf32, #tpu.memory_space<vmem>>, %arg4: memref<8x128xf32, #tpu.memory_space<vmem>>, %arg5: memref<8x128xf32, #tpu.memory_space<vmem>>, %arg6: memref<4x8x128xf32, #tpu.memory_space<vmem>>, %arg7: memref<8x128xf32, #tpu.memory_space<vmem>>, %arg8: memref<8x128xf32, #tpu.memory_space<vmem>>, %arg9: memref<1x8x128xf32, #tpu.memory_space<vmem>>, %arg10: memref<4x8x128xf32, #tpu.memory_space<vmem>>) attributes {dimension_semantics = [#tpu.dimension_semantics<parallel>, #tpu.dimension_semantics<arbitrary>], iteration_bounds = array<i64: 1, 1>, scalar_prefetch = 0 : i64, scratch_operands = 0 : i64, tpu.core_type = #tpu.core_type<tc>, window_params = [{transform_indices = @transform_0, window_bounds = array<i64: 2>}, {transform_indices = @transform_1, window_bounds = array<i64: 1, 8, 128>}, {transform_indices = @transform_2, window_bounds = array<i64: 8, 128>}, {transform_indices = @transform_3, window_bounds = array<i64: 8, 128>}, {transform_indices = @transform_4, window_bounds = array<i64: 4, 8, 128>}, {transform_indices = @transform_5, window_bounds = array<i64: 8, 128>}, {transform_indices = @transform_6, window_bounds = array<i64: 8, 128>}, {transform_indices = @transform_7, window_bounds = array<i64: 1, 8, 128>}, {transform_indices = @transform_8, window_bounds = array<i64: 4, 8, 128>}]} {
    %c0_i32 = arith.constant 0 : i32
    %0 = arith.cmpi eq, %arg1, %c0_i32 : i32
    %1 = arith.extui %0 : i1 to i32
    %c0_i32_0 = arith.constant 0 : i32
    %2 = arith.cmpi ne, %1, %c0_i32_0 : i32
    scf.if %2 {
      %c0_28 = arith.constant 0 : index
      %c0_29 = arith.constant 0 : index
      %69 = vector.load %arg4[%c0_28, %c0_29] : memref<8x128xf32, #tpu.memory_space<vmem>>, vector<8x128xf32>
      %c0_30 = arith.constant 0 : index
      %c0_31 = arith.constant 0 : index
      %70 = vector.load %arg7[%c0_30, %c0_31] : memref<8x128xf32, #tpu.memory_space<vmem>>, vector<8x128xf32>
      tpu.vector_store %arg7[%c0_30, %c0_31], %69 {strides = array<i32>} : memref<8x128xf32, #tpu.memory_space<vmem>>, vector<8x128xf32>,
      %c0_32 = arith.constant 0 : index
      %c0_33 = arith.constant 0 : index
      %71 = vector.load %arg5[%c0_32, %c0_33] : memref<8x128xf32, #tpu.memory_space<vmem>>, vector<8x128xf32>
      %c0_34 = arith.constant 0 : index
      %c0_35 = arith.constant 0 : index
      %72 = vector.load %arg8[%c0_34, %c0_35] : memref<8x128xf32, #tpu.memory_space<vmem>>, vector<8x128xf32>
      tpu.vector_store %arg8[%c0_34, %c0_35], %71 {strides = array<i32>} : memref<8x128xf32, #tpu.memory_space<vmem>>, vector<8x128xf32>,
      %c0_36 = arith.constant 0 : index
      %c0_37 = arith.constant 0 : index
      %c0_38 = arith.constant 0 : index
      %73 = vector.load %arg6[%c0_36, %c0_37, %c0_38] : memref<4x8x128xf32, #tpu.memory_space<vmem>>, vector<4x8x128xf32>
      %c0_39 = arith.constant 0 : index
      %c0_40 = arith.constant 0 : index
      %c0_41 = arith.constant 0 : index
      %74 = vector.load %arg10[%c0_39, %c0_40, %c0_41] : memref<4x8x128xf32, #tpu.memory_space<vmem>>, vector<4x8x128xf32>
      tpu.vector_store %arg10[%c0_39, %c0_40, %c0_41], %73 {strides = array<i32>} : memref<4x8x128xf32, #tpu.memory_space<vmem>>, vector<4x8x128xf32>,
    } else {
    }
    %c0 = arith.constant 0 : index
    %3 = memref.load %arg2[%c0] : memref<2xi32, #tpu.memory_space<smem>>
    %c1 = arith.constant 1 : index
    %4 = memref.load %arg2[%c1] : memref<2xi32, #tpu.memory_space<smem>>
    %c1_i32 = arith.constant 1 : i32
    %5 = arith.muli %arg1, %c1_i32 : i32
    %6 = arith.addi %3, %5 : i32
    %c4_i32 = arith.constant 4 : i32
    %c0_i32_1 = arith.constant 0 : i32
    %7 = arith.cmpi eq, %c4_i32, %c0_i32_1 : i32
    %c1_i32_2 = arith.constant 1 : i32
    %8 = arith.select %7, %c1_i32_2, %c4_i32 : i32
    %9 = arith.remsi %6, %8 : i32
    %c0_i32_3 = arith.constant 0 : i32
    %10 = arith.cmpi ne, %9, %c0_i32_3 : i32
    %c0_i32_4 = arith.constant 0 : i32
    %11 = arith.cmpi slt, %9, %c0_i32_4 : i32
    %c0_i32_5 = arith.constant 0 : i32
    %12 = arith.cmpi slt, %8, %c0_i32_5 : i32
    %13 = arith.xori %11, %12 : i1
    %14 = arith.andi %13, %10 : i1
    %15 = arith.addi %9, %8 : i32
    %16 = arith.select %14, %15, %9 : i32
    %c0_6 = arith.constant 0 : index
    %c0_7 = arith.constant 0 : index
    %17 = vector.load %arg7[%c0_6, %c0_7] : memref<8x128xf32, #tpu.memory_space<vmem>>, vector<8x128xf32>
    %c0_8 = arith.constant 0 : index
    %c0_9 = arith.constant 0 : index
    %18 = vector.load %arg8[%c0_8, %c0_9] : memref<8x128xf32, #tpu.memory_space<vmem>>, vector<8x128xf32>
    %c0_i32_10 = arith.constant 0 : i32
    %19 = arith.addi %5, %c0_i32_10 : i32
    %20 = arith.cmpi slt, %19, %4 : i32
    %21 = arith.index_cast %c0_i32_10 : i32 to index
    %c0_11 = arith.constant 0 : index
    %c0_12 = arith.constant 0 : index
    %22 = vector.load %arg3[%21, %c0_11, %c0_12] : memref<1x8x128xf32, #tpu.memory_space<vmem>>, vector<1x8x128xf32>
    %23 = vector.shape_cast %22 : vector<1x8x128xf32> to vector<8x128xf32>
    %24 = arith.index_cast %16 : i32 to index
    %c0_13 = arith.constant 0 : index
    %c0_14 = arith.constant 0 : index
    %25 = vector.load %arg10[%24, %c0_13, %c0_14] : memref<4x8x128xf32, #tpu.memory_space<vmem>>, vector<1x8x128xf32>
    %26 = vector.shape_cast %25 : vector<1x8x128xf32> to vector<8x128xf32>
    %cst = arith.constant 0.000000e+00 : f32
    %27 = vector.broadcast %cst : f32 to vector<8x128xf32>
    %28 = arith.subf %27, %26 : vector<8x128xf32>
    %29 = arith.addf %17, %28 : vector<8x128xf32>
    %30 = math.absf %17 : vector<8x128xf32>
    %31 = math.absf %28 : vector<8x128xf32>
    %32 = arith.cmpf oge, %30, %31 : vector<8x128xf32>
    %33 = arith.subf %17, %29 : vector<8x128xf32>
    %34 = arith.addf %33, %28 : vector<8x128xf32>
    %35 = arith.subf %28, %29 : vector<8x128xf32>
    %36 = arith.addf %35, %17 : vector<8x128xf32>
    %37 = arith.select %32, %34, %36 : vector<8x128xi1>, vector<8x128xf32>
    %38 = arith.addf %18, %37 : vector<8x128xf32>
    %39 = arith.addf %29, %23 : vector<8x128xf32>
    %40 = math.absf %29 : vector<8x128xf32>
    %41 = math.absf %23 : vector<8x128xf32>
    %42 = arith.cmpf oge, %40, %41 : vector<8x128xf32>
    %43 = arith.subf %29, %39 : vector<8x128xf32>
    %44 = arith.addf %43, %23 : vector<8x128xf32>
    %45 = arith.subf %23, %39 : vector<8x128xf32>
    %46 = arith.addf %45, %29 : vector<8x128xf32>
    %47 = arith.select %42, %44, %46 : vector<8x128xi1>, vector<8x128xf32>
    %48 = arith.addf %38, %47 : vector<8x128xf32>
    %49 = arith.addf %39, %48 : vector<8x128xf32>
    %cst_15 = arith.constant 2.500000e-01 : f32
    %50 = vector.broadcast %cst_15 : f32 to vector<8x128xf32>
    %51 = arith.mulf %49, %50 : vector<8x128xf32>
    %52 = arith.index_cast %c0_i32_10 : i32 to index
    %c0_16 = arith.constant 0 : index
    %c0_17 = arith.constant 0 : index
    %53 = vector.load %arg9[%52, %c0_16, %c0_17] : memref<1x8x128xf32, #tpu.memory_space<vmem>>, vector<1x8x128xf32>
    %54 = vector.shape_cast %53 : vector<1x8x128xf32> to vector<8x128xf32>
    %55 = vector.shape_cast %51 : vector<8x128xf32> to vector<1x8x128xf32>
    tpu.vector_store %arg9[%52, %c0_16, %c0_17], %55 {strides = array<i32>} : memref<1x8x128xf32, #tpu.memory_space<vmem>>, vector<1x8x128xf32>,
    %56 = arith.select %20, %23, %26 : vector<8x128xf32>
    %57 = arith.index_cast %16 : i32 to index
    %c0_18 = arith.constant 0 : index
    %c0_19 = arith.constant 0 : index
    %58 = vector.load %arg10[%57, %c0_18, %c0_19] : memref<4x8x128xf32, #tpu.memory_space<vmem>>, vector<1x8x128xf32>
    %59 = vector.shape_cast %58 : vector<1x8x128xf32> to vector<8x128xf32>
    %60 = vector.shape_cast %56 : vector<8x128xf32> to vector<1x8x128xf32>
    tpu.vector_store %arg10[%57, %c0_18, %c0_19], %60 {strides = array<i32>} : memref<4x8x128xf32, #tpu.memory_space<vmem>>, vector<1x8x128xf32>,
    %c1_i32_20 = arith.constant 1 : i32
    %61 = arith.addi %16, %c1_i32_20 : i32
    %c4_i32_21 = arith.constant 4 : i32
    %62 = arith.cmpi eq, %61, %c4_i32_21 : i32
    %c0_i32_22 = arith.constant 0 : i32
    %63 = arith.select %62, %c0_i32_22, %61 : i32
    %64 = arith.select %20, %63, %16 : i32
    %65 = arith.select %20, %39, %17 : vector<8x128xf32>
    %66 = arith.select %20, %48, %18 : vector<8x128xf32>
    %c1_i32_23 = arith.constant 1 : i32
    %c0_24 = arith.constant 0 : index
    %c0_25 = arith.constant 0 : index
    %67 = vector.load %arg7[%c0_24, %c0_25] : memref<8x128xf32, #tpu.memory_space<vmem>>, vector<8x128xf32>
    tpu.vector_store %arg7[%c0_24, %c0_25], %65 {strides = array<i32>} : memref<8x128xf32, #tpu.memory_space<vmem>>, vector<8x128xf32>,
    %c0_26 = arith.constant 0 : index
    %c0_27 = arith.constant 0 : index
    %68 = vector.load %arg8[%c0_26, %c0_27] : memref<8x128xf32, #tpu.memory_space<vmem>>, vector<8x128xf32>
    tpu.vector_store %arg8[%c0_26, %c0_27], %66 {strides = array<i32>} : memref<8x128xf32, #tpu.memory_space<vmem>>, vector<8x128xf32>,
    return
  }
  func.func @transform_0(%arg0: i32, %arg1: i32) -> i32 {
    %c0_i32 = arith.constant 0 : i32
    %c0_i32_0 = arith.constant 0 : i32
    return %c0_i32 : i32
  }
  func.func @transform_1(%arg0: i32, %arg1: i32) -> (i32, i32, i32) {
    %c0_i32 = arith.constant 0 : i32
    %c0_i32_0 = arith.constant 0 : i32
    return %arg1, %c0_i32, %arg0 : i32, i32, i32
  }
  func.func @transform_2(%arg0: i32, %arg1: i32) -> (i32, i32) {
    %c0_i32 = arith.constant 0 : i32
    %c0_i32_0 = arith.constant 0 : i32
    return %c0_i32, %arg0 : i32, i32
  }
  func.func @transform_3(%arg0: i32, %arg1: i32) -> (i32, i32) {
    %c0_i32 = arith.constant 0 : i32
    %c0_i32_0 = arith.constant 0 : i32
    return %c0_i32, %arg0 : i32, i32
  }
  func.func @transform_4(%arg0: i32, %arg1: i32) -> (i32, i32, i32) {
    %c0_i32 = arith.constant 0 : i32
    %c0_i32_0 = arith.constant 0 : i32
    %c0_i32_1 = arith.constant 0 : i32
    return %c0_i32, %c0_i32_0, %arg0 : i32, i32, i32
  }
  func.func @transform_5(%arg0: i32, %arg1: i32) -> (i32, i32) {
    %c0_i32 = arith.constant 0 : i32
    %c0_i32_0 = arith.constant 0 : i32
    return %c0_i32, %arg0 : i32, i32
  }
  func.func @transform_6(%arg0: i32, %arg1: i32) -> (i32, i32) {
    %c0_i32 = arith.constant 0 : i32
    %c0_i32_0 = arith.constant 0 : i32
    return %c0_i32, %arg0 : i32, i32
  }
  func.func @transform_7(%arg0: i32, %arg1: i32) -> (i32, i32, i32) {
    %c0_i32 = arith.constant 0 : i32
    %c0_i32_0 = arith.constant 0 : i32
    return %arg1, %c0_i32, %arg0 : i32, i32, i32
  }
  func.func @transform_8(%arg0: i32, %arg1: i32) -> (i32, i32, i32) {
    %c0_i32 = arith.constant 0 : i32
    %c0_i32_0 = arith.constant 0 : i32
    %c0_i32_1 = arith.constant 0 : i32
    return %c0_i32, %c0_i32_0, %arg0 : i32, i32, i32
  }
}

</mosaic_0001>

<bundles_post_ra>
// kernel: step_fn.1
= control target key start
LH: loop header
LB: loop body
LE: loop exit
PB: predicated region body
PF: predicated region fallthrough
CT: control target
= control target key end

     0   :  { %14 = vsyncpa [#allocation5], 0  ;;  %s573_s0 = inlined_call_operand.hbm [shape: s32[2], index: 0, kind: input, shape index: {}]   ;;  %s574_s1 = inlined_call_operand.hbm [shape: f32[1,8,128], index: 1, kind: input, shape index: {}]   ;;  %s575_s2 = inlined_call_operand.hbm [shape: f32[8,128], index: 2, kind: input, shape index: {}, may-alias: {2,5}]   ;;  %s576_s3 = inlined_call_operand.hbm [shape: f32[8,128], index: 3, kind: input, shape index: {}, may-alias: {3,6}]   ;;  %s577_s4 = inlined_call_operand.hbm [shape: f32[4,8,128], index: 4, kind: input, shape index: {}, may-alias: {4,8}]   ;;  %s578_s5 = inlined_call_operand.hbm [shape: f32[8,128], index: 5, kind: output, shape index: {0}, may-alias: {2,5}]   ;;  %s579_s6 = inlined_call_operand.hbm [shape: f32[8,128], index: 6, kind: output, shape index: {1}, may-alias: {3,6}]   ;;  %s580_s7 = inlined_call_operand.hbm [shape: f32[1,8,128], index: 7, kind: output, shape index: {2}]   ;;  %s581_s8 = inlined_call_operand.hbm [shape: f32[4,8,128], index: 8, kind: output, shape index: {3}, may-alias: {4,8}]  }
   0x1   :  { %15 = vsyncpa [#allocation3], 0 }
   0x2   :  { %16 = vsyncpa [#allocation8], 0 }
   0x3   :  { %17 = vsyncpa [#allocation11], 0 }
   0x4   :  { %18 = vsyncpa [#allocation4], 0 }
   0x5   :  { %19 = vsyncpa [#allocation14], 0  ;;  %s46_s29 = sshll.u32 %s575_s2, 4  ;;  %s47_s29 = int_to_ptr.hbm [resolvable:$true] %s46_s29 }
   0x6   :  { %20 = vsyncpa [#allocation17], 0  ;;  %s474_s30 = smov [#allocation7]   ;;  %s26_s12 = sshll.u32 %s573_s0, 4  ;;  %s27_s12 = int_to_ptr.hbm [resolvable:$true] %s26_s12 }
   0x7   :  { %s48_s9 = sshll.u32 %s474_s30, 4  ;;  %s475_s13 = smov [#allocation2]   ;;  %s49_s9 = int_to_ptr.vmem [resolvable:$true] %s48_s9 }
   0x8   :  { %51 = dma.hbm_to_vmem [thread:$0]  %s47_s29, 128, %s49_s9, [#allocation8]  }
   0x9   :  { %29 = dma.hbm_to_smem %s27_s12, 16, %s475_s13, [#allocation5]  }
   0xa   :  { %s35_s16 = sshll.u32 %s574_s1, 4  ;;  %s476_s17 = smov [#allocation6]   ;;  %s36_s16 = int_to_ptr.hbm [resolvable:$true] %s35_s16 }
   0xb   :  { %s37_s2 = sshll.u32 %s476_s17, 4  ;;  %s57_s20 = sshll.u32 %s576_s3, 4  ;;  %s38_s2 = int_to_ptr.vmem [resolvable:$true] %s37_s2  ;;  %s58_s20 = int_to_ptr.hbm [resolvable:$true] %s57_s20 }
   0xc   :  { %40 = dma.hbm_to_vmem [thread:$0]  %s36_s16, 128, %s38_s2, [#allocation3]  }
   0xd   :  { %s477_s21 = smov [#allocation9]   ;;  %s67_s24 = sshll.u32 %s577_s4, 4  ;;  %s68_s24 = int_to_ptr.hbm [resolvable:$true] %s67_s24 }
   0xe   :  { %s59_s0 = sshll.u32 %s477_s21, 4  ;;  %s478_s1 = smov [#allocation10]   ;;  %s60_s0 = int_to_ptr.vmem [resolvable:$true] %s59_s0 }
   0xf   :  { %62 = dma.hbm_to_vmem [thread:$0]  %s58_s20, 128, %s60_s0, [#allocation8]  }
  0x10   :  { %s69_s25 = sshll.u32 %s478_s1, 4  ;;  %s479_s26 = smov 128   ;;  %s70_s25 = int_to_ptr.vmem [resolvable:$true] %s69_s25 }
  0x11   :  { %s480_s27 = smov 8  }
  0x12   :  { %75 = dma.hbm_to_vmem [thread:$0]  %s68_s24, 512, %s70_s25, [#allocation11], %s479_s26, %s479_s26, %s480_s27  }
  0x13   :  { %460 = dma.done.wait [#allocation5], 16  }
  0x14   :  { %461 = vsyncadd [#allocation5], 4294967280 }
  0x15   :  { %462 = dma.done.wait [#allocation3], 128  }
  0x16   :  { %463 = vsyncadd [#allocation3], 4294967168 }
  0x17   :  { %464 = dma.done.wait [#allocation8], 256  }
  0x18   :  { %465 = vsyncadd [#allocation8], 4294967040 }
  0x19   :  { %466 = dma.done.wait [#allocation11], 512  }
  0x1a   :  { %467 = vsyncadd [#allocation11], 4294966784 }
  0x1b   :  { %96 = sfence }
  0x1c   :  { %v105_v0 = vld [vmem:[#allocation10] sm:$0xff]  ;;  %v106_v1 = vld [vmem:[#allocation10 + $0x8] sm:$0xff]  ;;  %v107_v2 = vld [vmem:[#allocation10 + $0x10] sm:$0xff]  ;;  %s113_s3 = sld [smem:[#allocation2]]  ;;  %s481_s13 = smov [#allocation16]  }
  0x1d   :  { %109 = vst [vmem:[#allocation16] sm:$0xff] %v105_v0  ;;  %v108_v3 = vld [vmem:[#allocation10 + $0x18] sm:$0xff]  ;;  %s239_s4 = sld [smem:[#allocation2 + $0x1]]  ;;  %v131_v5 = vld [vmem:[#allocation6] sm:$0xff]  ;;  %s205_s14 = sshll.u32 %s481_s13, 4  ;;  %v101_v7 = vld [vmem:[#allocation7] sm:$0xff]  ;;  %s206_s14 = int_to_ptr.vmem [resolvable:$true] %s205_s14 }
  0x1e   :  { %110 = vst [vmem:[#allocation16 + $0x8] sm:$0xff] %v106_v1  ;;  %s207_s2 = sshll.u32 %s581_s8, 4  ;;  %s482_s18 = smov [#allocation12]   ;;  %v137_v12 = vand.u32 2147483647, %v101_v7  ;;  %v103_v19 = vld [vmem:[#allocation9] sm:$0xff]  ;;  %s208_s2 = int_to_ptr.hbm [resolvable:$true] %s207_s2 }
  0x1f   :  { %111 = vst [vmem:[#allocation16 + $0x10] sm:$0xff] %v107_v2  ;;  %s173_s19 = sshll.u32 %s482_s18, 4  ;;  %s175_s0 = sshll.u32 %s578_s5, 4  ;;  %v148_v18 = vand.u32 2147483647, %v131_v5  ;;  %s174_s19 = int_to_ptr.vmem [resolvable:$true] %s173_s19  ;;  %s176_s0 = int_to_ptr.hbm [resolvable:$true] %s175_s0 }
  0x20   :  { %112 = vst [vmem:[#allocation16 + $0x18] sm:$0xff] %v108_v3  ;;  %s483_s5 = smov [#allocation13]   ;;  %s186_s24 = sshll.u32 %s579_s6, 4  ;;  %s187_s24 = int_to_ptr.hbm [resolvable:$true] %s186_s24 }
  0x21   :  { %s184_s8 = sshll.u32 %s483_s5, 4  ;;  %s484_s1 = smov [#allocation15]   ;;  %s185_s8 = int_to_ptr.vmem [resolvable:$true] %s184_s8 }
  0x22   :  { %p116_p0 = scmp.lt.s32.totalorder %s113_s3, 0  ;;  %s117_s28 = ssub.s32 0, %s113_s3 }
  0x23   :  { %s240_s29 = smin.u32 %s117_s28, %s113_s3  ;;  %p243_p1 = scmp.gt.s32.totalorder %s239_s4, 0 }
  0x24   :  { %s119_s30 = sand.u32 3, %s240_s29   ;;  %s195_s25 = sshll.u32 %s484_s1, 4  ;;  %s196_s25 = int_to_ptr.vmem [resolvable:$true] %s195_s25 }
  0x25   :  { %s120_s9 = ssub.s32 0, %s119_s30  ;;  %s197_s3 = sshll.u32 %s580_s7, 4  ;;  %s198_s3 = int_to_ptr.hbm [resolvable:$true] %s197_s3 }
  0x26   :  { %s585_s9 = smov (!%p116_p0, %s120_s9), %s119_s30 }
  0x27   :  { %s159_s10 = scalar_select %p243_p1, 1, 0 }
  0x28   :  { %p242_p2 = scmp.lt.s32.totalorder %s585_s9, 0  ;;  %s126_s11 = sadd.s32 4, %s585_s9 }
  0x29   :  { %v160_v4 = vstv %s159_s10 }
  0x2a   :  { %s587_s11 = smov (!%p242_p2, %s126_s11), %s585_s9  ;;  %vm548_vm0 = vcmp.eq.s32.totalorder %v160_v4, 1 }
  0x2b   :  { %s244_s12 = sshll.u32 %s587_s11, 3 }
  0x2c   :  { %s133_s15 = scalar_lea.vmem [#allocation16], %s244_s12 }
  0x2d   :  { %v134_v8 = vld [vmem:[%s133_s15] sm:$0xff] }
  0x2e   :  { %v135_v9 = vsub.f32 0.0, %v134_v8  ;;  %v162_v10 = vsel %vm548_vm0, %v131_v5, %v134_v8 }
  0x2f   :  { %163 = vst [vmem:[%s133_s15] sm:$0xff] %v162_v10 }
  0x30   :  { %v136_v11 = vadd.f32 %v135_v9, %v101_v7  ;;  %213 = dma.vmem_to_hbm [thread:$0]  %s206_s14, 512, %s208_s2, [#allocation17], %s479_s26, %s479_s26, %s480_s27   ;;  %v138_v13 = vand.u32 2147483647, %v135_v9 }
  0x32   :  { %v146_v14 = vadd.f32 %v136_v11, %v131_v5  ;;  %v140_v15 = vsub.f32 %v101_v7, %v136_v11  ;;  %v142_v16 = vsub.f32 %v135_v9, %v136_v11  ;;  %v147_v17 = vand.u32 2147483647, %v136_v11 }
  0x33   :  { %vm139_vm1 = vcmp.ge.f32.partialorder %v137_v12, %v138_v13 }
  0x34   :  { %v164_v20 = vsel %vm548_vm0, %v146_v14, %v101_v7  ;;  %v141_v21 = vadd.f32 %v140_v15, %v135_v9  ;;  %v143_v22 = vadd.f32 %v142_v16, %v101_v7  ;;  %v150_v23 = vsub.f32 %v136_v11, %v146_v14 }
  0x35   :  { %166 = vst [vmem:[#allocation12] sm:$0xff] %v164_v20  ;;  %v152_v24 = vsub.f32 %v131_v5, %v146_v14  ;;  %vm149_vm2 = vcmp.ge.f32.partialorder %v147_v17, %v148_v18 }
  0x36   :  { %v144_v25 = vsel %vm139_vm1, %v141_v21, %v143_v22  ;;  %v151_v26 = vadd.f32 %v150_v23, %v131_v5  ;;  %178 = dma.vmem_to_hbm [thread:$0]  %s174_s19, 128, %s176_s0, [#allocation4]  }
  0x37   :  { %v145_v27 = vadd.f32 %v144_v25, %v103_v19  ;;  %v153_v28 = vadd.f32 %v152_v24, %v136_v11 }
  0x39   :  { %v154_v29 = vsel %vm149_vm2, %v151_v26, %v153_v28 }
  0x3a   :  { %v155_v30 = vadd.f32 %v154_v29, %v145_v27 }
  0x3c   :  { %v165_v31 = vsel %vm548_vm0, %v155_v30, %v103_v19  ;;  %v156_v32 = vadd.f32 %v155_v30, %v146_v14 }
  0x3d   :  { %167 = vst [vmem:[#allocation13] sm:$0xff] %v165_v31 }
  0x3e   :  { %v157_v33 = vmul.f32 0.25, %v156_v32  ;;  %189 = dma.vmem_to_hbm [thread:$0]  %s185_s8, 128, %s187_s24, [#allocation14]  }
  0x40   :  { %158 = vst [vmem:[#allocation15] sm:$0xff] %v157_v33 }
  0x41   :  { %200 = dma.vmem_to_hbm [thread:$0]  %s196_s25, 128, %s198_s3, [#allocation14]  }
  0x42   :  { %468 = dma.done.wait [#allocation4], 128  }
  0x43   :  { %469 = vsyncadd [#allocation4], 4294967168 }
  0x44   :  { %470 = dma.done.wait [#allocation14], 256  }
  0x45   :  { %471 = vsyncadd [#allocation14], 4294967040 }
  0x46   :  { %472 = dma.done.wait [#allocation17], 512  }
  0x47   :  { %473 = vsyncadd [#allocation17], 4294966784 }
  0x48   :  { %230 = vsyncpa [#allocation3], 1 }
  0x49   :  { %231 = vsyncpa [#allocation8], 1 }
  0x4a   :  { %232 = vsyncpa [#allocation11], 1 }
  0x4b   :  { %233 = vsyncpa [#allocation4], 1 }
  0x4c   :  { %234 = vsyncpa [#allocation14], 1 }
  0x4d   :  { %235 = vsyncpa [#allocation17], 1 }
  0x4e   :  { %236 = vsyncpa [#allocation5], 1 }

</bundles_post_ra>
